<compile_context>
chip_gen: v7x
topology: tpu7x:2x2x1
jax: 0.10.0
libtpu: 0.0.40
codegen_flags: <defaults>
</compile_context>

<pallas_src>
import math
import functools

import jax
import jax.numpy as jnp
from jax.experimental import pallas as pl
from jax.experimental.pallas import tpu as pltpu

# ---------------- model hyper-parameters (small, deterministic) -------------
BATCH = 2
SEQ = 8
HIDDEN = 32
NUM_HEADS = 4
HEAD_DIM = HIDDEN // NUM_HEADS


def _mha_kernel(xg_ref, maskg_ref, wqkv_ref, bqkv_ref, wo_ref, bo_ref, o_ref,
                *, batch, num_heads, head_dim):
    """Single-step kernel. Leading axis g = batch * num_heads ("group"):
       g = b * num_heads + h. All contractions are batched over g."""
    inv_sqrt_d = 1.0 / math.sqrt(head_dim)

    xg = xg_ref[...]                                        # (G, S, H)  bf16

    # ---- fused QKV projection: one batched contraction for all (b, h) ------
    qkv = jnp.einsum("gsh,ghd->gsd", xg, wqkv_ref[...],
                     preferred_element_type=jnp.float32)
    qkv = qkv + bqkv_ref[...]                               # (G, S, 3*hd) f32

    q = qkv[..., :head_dim]                                 # (G, S, hd)
    k = qkv[..., head_dim:2 * head_dim]
    v = qkv[..., 2 * head_dim:]

    # ---- scaled dot-product attention, all heads/batches batched over g ----
    scores = jnp.einsum("gqd,gkd->gqk",
                        q.astype(jnp.bfloat16), k.astype(jnp.bfloat16),
                        preferred_element_type=jnp.float32) * inv_sqrt_d
    scores = scores + maskg_ref[...]                        # additive mask, f32
    probs = jax.nn.softmax(scores, axis=-1)                 # f32 softmax
    # attention dropout -> identity in eval mode
    # TODO(synk): training-mode dropout (pltpu.prng_*) not implemented.
    ctx = jnp.einsum("gqk,gkd->gqd",
                     probs.astype(jnp.bfloat16), v.astype(jnp.bfloat16),
                     preferred_element_type=jnp.float32)    # (G, S, hd)

    # ---- output projection: per-head partials, then reduce over heads ------
    out_p = jnp.einsum("gsd,gde->gse",
                       ctx.astype(jnp.bfloat16), wo_ref[...],
                       preferred_element_type=jnp.float32)  # (G, S, H)
    out_p = out_p.reshape(batch, num_heads, *out_p.shape[1:])   # (B, nH, S, H)
    out = out_p[:, 0]
    for h in range(1, num_heads):                           # static unroll
        out = out + out_p[:, h]
    out = out + bo_ref[...]                                 # (B, S, H) f32
    o_ref[...] = out.astype(o_ref.dtype)


def multi_head_attention(x, attention_mask, params, *, num_heads=NUM_HEADS):
    """x: (B, S, H) f32; attention_mask: (B, S, S) additive mask (f32)."""
    B, S, H = x.shape
    hd = H // num_heads
    G = B * num_heads

    wq, wk, wv, wo = params["wq"], params["wk"], params["wv"], params["wo"]
    bq, bk, bv, bo = params["bq"], params["bk"], params["bv"], params["bo"]

    # ---- wrapper-side layout plumbing only (no compute hoisted) ------------
    def head_cols(w):          # (H, H)(in,out) -> (num_heads, H, hd)
        return w.reshape(H, num_heads, hd).transpose(1, 0, 2)

    # fused per-head QKV weight, columns = [q | k | v] per head, tiled over B
    w_qkv = jnp.concatenate([head_cols(wq), head_cols(wk), head_cols(wv)], axis=-1)
    w_qkv = jnp.tile(w_qkv, (B, 1, 1)).astype(jnp.bfloat16)         # (G, H, 3*hd)

    b_qkv = jnp.concatenate([bq.reshape(num_heads, 1, hd),
                             bk.reshape(num_heads, 1, hd),
                             bv.reshape(num_heads, 1, hd)], axis=-1)
    b_qkv = jnp.tile(b_qkv, (B, 1, 1))                              # (G, 1, 3*hd) f32

    # output-projection rows split by head, tiled over B
    w_o = jnp.tile(wo.reshape(num_heads, hd, H), (B, 1, 1)).astype(jnp.bfloat16)  # (G, hd, H)
    b_o = bo.reshape(1, 1, H)                                        # f32

    # activations / mask broadcast to head-major "group" layout
    x_g = jnp.broadcast_to(x[:, None], (B, num_heads, S, H)).reshape(G, S, H)
    x_g = x_g.astype(jnp.bfloat16)
    mask_g = jnp.broadcast_to(attention_mask[:, None],
                              (B, num_heads, S, S)).reshape(G, S, S)

    kernel = functools.partial(_mha_kernel, batch=B, num_heads=num_heads,
                               head_dim=hd)

    full = lambda shape: pl.BlockSpec(shape, lambda i, _s=len(shape): (0,) * _s)

    return pl.pallas_call(
        kernel,
        out_shape=jax.ShapeDtypeStruct((B, S, H), x.dtype),
        grid_spec=pltpu.PrefetchScalarGridSpec(
            num_scalar_prefetch=0,
            grid=(1,),
            in_specs=[
                full((G, S, H)),        # x (head-major broadcast, bf16)
                full((G, S, S)),        # additive mask per (batch, head)
                full((G, H, 3 * hd)),   # fused per-head QKV weight (bf16)
                full((G, 1, 3 * hd)),   # fused per-head QKV bias (f32)
                full((G, hd, H)),       # per-head rows of output projection (bf16)
                full((1, 1, H)),        # output bias (f32)
            ],
            out_specs=full((B, S, H)),
        ),
        compiler_params=pltpu.CompilerParams(
            dimension_semantics=("arbitrary",),
        ),
    )(x_g, mask_g, w_qkv, b_qkv, w_o, b_o)


def init_params(key):
    """Deterministic synthetic parameters. Linear weights stored as (in, out)
    (already transposed relative to PyTorch's (out, in)); biases as (H,)."""
    ks = jax.random.split(key, 8)
    std = 0.1
    w = lambda k: jax.random.normal(k, (HIDDEN, HIDDEN), jnp.float32) * std
    b = lambda k: jax.random.normal(k, (HIDDEN,), jnp.float32) * std
    return {
        "wq": w(ks[0]), "bq": b(ks[4]),
        "wk": w(ks[1]), "bk": b(ks[5]),
        "wv": w(ks[2]), "bv": b(ks[6]),
        "wo": w(ks[3]), "bo": b(ks[7]),
    }


def _reference(x, mask, p):
    """Pure-JAX f32 reference of the PyTorch forward (eval mode)."""
    B, S, H = x.shape
    hd = H // NUM_HEADS
    q = x @ p["wq"] + p["bq"]
    k = x @ p["wk"] + p["bk"]
    v = x @ p["wv"] + p["bv"]
    split = lambda t: t.reshape(B, S, NUM_HEADS, hd).transpose(0, 2, 1, 3)
    qh, kh, vh = split(q), split(k), split(v)
    scores = jnp.einsum("bhqd,bhkd->bhqk", qh, kh) / math.sqrt(hd)
    scores = scores + mask[:, None]
    probs = jax.nn.softmax(scores, axis=-1)
    ctx = jnp.einsum("bhqk,bhkd->bhqd", probs, vh)
    ctx = ctx.transpose(0, 2, 1, 3).reshape(B, S, H)
    return ctx @ p["wo"] + p["bo"]


if __name__ == "__main__":
    key = jax.random.PRNGKey(0)
    k_x, k_p = jax.random.split(key)

    x = jax.random.normal(k_x, (BATCH, SEQ, HIDDEN), jnp.float32)
    # BERT-style additive mask (0 = visible, -10000 = masked); causal pattern
    causal = jnp.tril(jnp.ones((SEQ, SEQ), jnp.float32))
    attn_mask = jnp.broadcast_to((1.0 - causal) * -10000.0, (BATCH, SEQ, SEQ))
    params = init_params(k_p)

    out = multi_head_attention(x, attn_mask, params)
    out = jax.block_until_ready(out)

    ref = _reference(x, attn_mask, params)
    assert out.shape == (BATCH, SEQ, HIDDEN)
    max_err = float(jnp.max(jnp.abs(out - ref)))
    # bf16 MXU operands (f32 accumulation) -> relaxed tolerance vs f32 reference
    assert jnp.allclose(out, ref, atol=2e-2, rtol=2e-2), \
        f"mismatch vs reference (max abs err {max_err})"

    print("KERNEL_OK")
</pallas_src>

<mosaic_0001>
module attributes {stable_mosaic.version = 11 : i64} {
  func.func @_mha_kernel(%arg0: i32, %arg1: memref<8x8x32xbf16, #tpu.memory_space<vmem>>, %arg2: memref<8x8x8xf32, #tpu.memory_space<vmem>>, %arg3: memref<8x32x24xbf16, #tpu.memory_space<vmem>>, %arg4: memref<8x1x24xf32, #tpu.memory_space<vmem>>, %arg5: memref<8x8x32xbf16, #tpu.memory_space<vmem>>, %arg6: memref<1x1x32xf32, #tpu.memory_space<vmem>>, %arg7: memref<2x8x32xf32, #tpu.memory_space<vmem>>) attributes {dimension_semantics = [#tpu.dimension_semantics<arbitrary>], iteration_bounds = array<i64: 1>, scalar_prefetch = 0 : i64, scratch_operands = 0 : i64, tpu.core_type = #tpu.core_type<tc>, window_params = [{pipeline_mode = #tpu.pipeline_mode<synchronous>, transform_indices = @transform_0, window_bounds = array<i64: 8, 8, 32>}, {pipeline_mode = #tpu.pipeline_mode<synchronous>, transform_indices = @transform_1, window_bounds = array<i64: 8, 8, 8>}, {pipeline_mode = #tpu.pipeline_mode<synchronous>, transform_indices = @transform_2, window_bounds = array<i64: 8, 32, 24>}, {pipeline_mode = #tpu.pipeline_mode<synchronous>, transform_indices = @transform_3, window_bounds = array<i64: 8, 1, 24>}, {pipeline_mode = #tpu.pipeline_mode<synchronous>, transform_indices = @transform_4, window_bounds = array<i64: 8, 8, 32>}, {pipeline_mode = #tpu.pipeline_mode<synchronous>, transform_indices = @transform_5, window_bounds = array<i64: 1, 1, 32>}, {pipeline_mode = #tpu.pipeline_mode<synchronous>, transform_indices = @transform_6, window_bounds = array<i64: 2, 8, 32>}]} {
    %c0 = arith.constant 0 : index
    %c0_0 = arith.constant 0 : index
    %c0_1 = arith.constant 0 : index
    %0 = vector.load %arg1[%c0, %c0_0, %c0_1] : memref<8x8x32xbf16, #tpu.memory_space<vmem>>, vector<8x8x32xbf16>
    %c0_2 = arith.constant 0 : index
    %c0_3 = arith.constant 0 : index
    %c0_4 = arith.constant 0 : index
    %1 = vector.load %arg3[%c0_2, %c0_3, %c0_4] : memref<8x32x24xbf16, #tpu.memory_space<vmem>>, vector<8x32x24xbf16>
    "tpu.trace_start"() <{level = 10 : i32, message = "gsh,ghd->gsd"}> : () -> ()
    %cst = arith.constant dense<0.000000e+00> : vector<8x8x24xf32>
    %2 = tpu.matmul %0, %1, %cst {dimension_numbers = #tpu.dot_dimension_numbers<[2], [1], [1], [2], [0, 0, 0, 1, 1, 2], [0], [0]>} : vector<8x8x32xbf16>, vector<8x32x24xbf16>, vector<8x8x24xf32> -> vector<8x8x24xf32>
    "tpu.trace_stop"() : () -> ()
    %c0_5 = arith.constant 0 : index
    %c0_6 = arith.constant 0 : index
    %c0_7 = arith.constant 0 : index
    %3 = vector.load %arg4[%c0_5, %c0_6, %c0_7] : memref<8x1x24xf32, #tpu.memory_space<vmem>>, vector<8x1x24xf32>
    %4 = vector.broadcast %3 : vector<8x1x24xf32> to vector<8x8x24xf32>
    %5 = arith.addf %2, %4 : vector<8x8x24xf32>
    %6 = vector.extract_strided_slice %5 {offsets = [0, 0, 0], sizes = [8, 8, 8], strides = [1, 1, 1]} : vector<8x8x24xf32> to vector<8x8x8xf32>
    %7 = vector.extract_strided_slice %5 {offsets = [0, 0, 8], sizes = [8, 8, 8], strides = [1, 1, 1]} : vector<8x8x24xf32> to vector<8x8x8xf32>
    %8 = vector.extract_strided_slice %5 {offsets = [0, 0, 16], sizes = [8, 8, 8], strides = [1, 1, 1]} : vector<8x8x24xf32> to vector<8x8x8xf32>
    %9 = arith.truncf %6 : vector<8x8x8xf32> to vector<8x8x8xbf16>
    %10 = arith.truncf %7 : vector<8x8x8xf32> to vector<8x8x8xbf16>
    "tpu.trace_start"() <{level = 10 : i32, message = "gqd,gkd->gqk"}> : () -> ()
    %cst_8 = arith.constant dense<0.000000e+00> : vector<8x8x8xf32>
    %11 = tpu.matmul %9, %10, %cst_8 {dimension_numbers = #tpu.dot_dimension_numbers<[2], [2], [1], [1], [0, 0, 0, 1, 1, 1], [0], [0]>} : vector<8x8x8xbf16>, vector<8x8x8xbf16>, vector<8x8x8xf32> -> vector<8x8x8xf32>
    "tpu.trace_stop"() : () -> ()
    %cst_9 = arith.constant 0.353553385 : f32
    %12 = vector.broadcast %cst_9 : f32 to vector<8x8x8xf32>
    %13 = arith.mulf %11, %12 : vector<8x8x8xf32>
    %c0_10 = arith.constant 0 : index
    %c0_11 = arith.constant 0 : index
    %c0_12 = arith.constant 0 : index
    %14 = vector.load %arg2[%c0_10, %c0_11, %c0_12] : memref<8x8x8xf32, #tpu.memory_space<vmem>>, vector<8x8x8xf32>
    %15 = arith.addf %13, %14 : vector<8x8x8xf32>
    %cst_13 = arith.constant dense<0xFF800000> : vector<8x8xf32>
    %16 = vector.multi_reduction <maximumf>, %15, %cst_13 [2] : vector<8x8x8xf32> to vector<8x8xf32>
    %cst_14 = arith.constant 0xFF800000 : f32
    %17 = vector.broadcast %cst_14 : f32 to vector<8x8xf32>
    %18 = arith.maximumf %17, %16 : vector<8x8xf32>
    %19 = vector.shape_cast %18 : vector<8x8xf32> to vector<8x8x1xf32>
    %20 = vector.broadcast %19 : vector<8x8x1xf32> to vector<8x8x8xf32>
    %21 = arith.subf %15, %20 : vector<8x8x8xf32>
    %22 = math.exp %21 : vector<8x8x8xf32>
    %cst_15 = arith.constant dense<0.000000e+00> : vector<8x8xf32>
    %23 = vector.multi_reduction <add>, %22, %cst_15 [2] : vector<8x8x8xf32> to vector<8x8xf32>
    %24 = vector.shape_cast %23 : vector<8x8xf32> to vector<8x8x1xf32>
    %25 = vector.broadcast %24 : vector<8x8x1xf32> to vector<8x8x8xf32>
    %26 = arith.divf %22, %25 : vector<8x8x8xf32>
    %27 = arith.truncf %26 : vector<8x8x8xf32> to vector<8x8x8xbf16>
    %28 = arith.truncf %8 : vector<8x8x8xf32> to vector<8x8x8xbf16>
    "tpu.trace_start"() <{level = 10 : i32, message = "gqk,gkd->gqd"}> : () -> ()
    %cst_16 = arith.constant dense<0.000000e+00> : vector<8x8x8xf32>
    %29 = tpu.matmul %27, %28, %cst_16 {dimension_numbers = #tpu.dot_dimension_numbers<[2], [1], [1], [2], [0, 0, 0, 1, 1, 2], [0], [0]>} : vector<8x8x8xbf16>, vector<8x8x8xbf16>, vector<8x8x8xf32> -> vector<8x8x8xf32>
    "tpu.trace_stop"() : () -> ()
    %30 = arith.truncf %29 : vector<8x8x8xf32> to vector<8x8x8xbf16>
    %c0_17 = arith.constant 0 : index
    %c0_18 = arith.constant 0 : index
    %c0_19 = arith.constant 0 : index
    %31 = vector.load %arg5[%c0_17, %c0_18, %c0_19] : memref<8x8x32xbf16, #tpu.memory_space<vmem>>, vector<8x8x32xbf16>
    "tpu.trace_start"() <{level = 10 : i32, message = "gsd,gde->gse"}> : () -> ()
    %cst_20 = arith.constant dense<0.000000e+00> : vector<8x8x32xf32>
    %32 = tpu.matmul %30, %31, %cst_20 {dimension_numbers = #tpu.dot_dimension_numbers<[2], [1], [1], [2], [0, 0, 0, 1, 1, 2], [0], [0]>} : vector<8x8x8xbf16>, vector<8x8x32xbf16>, vector<8x8x32xf32> -> vector<8x8x32xf32>
    "tpu.trace_stop"() : () -> ()
    %33 = vector.shape_cast %32 : vector<8x8x32xf32> to vector<2x4x8x32xf32>
    %34 = vector.extract_strided_slice %33 {offsets = [0, 0, 0, 0], sizes = [2, 1, 8, 32], strides = [1, 1, 1, 1]} : vector<2x4x8x32xf32> to vector<2x1x8x32xf32>
    %35 = vector.shape_cast %34 : vector<2x1x8x32xf32> to vector<2x8x32xf32>
    %36 = vector.extract_strided_slice %33 {offsets = [0, 1, 0, 0], sizes = [2, 1, 8, 32], strides = [1, 1, 1, 1]} : vector<2x4x8x32xf32> to vector<2x1x8x32xf32>
    %37 = vector.shape_cast %36 : vector<2x1x8x32xf32> to vector<2x8x32xf32>
    %38 = arith.addf %35, %37 : vector<2x8x32xf32>
    %39 = vector.extract_strided_slice %33 {offsets = [0, 2, 0, 0], sizes = [2, 1, 8, 32], strides = [1, 1, 1, 1]} : vector<2x4x8x32xf32> to vector<2x1x8x32xf32>
    %40 = vector.shape_cast %39 : vector<2x1x8x32xf32> to vector<2x8x32xf32>
    %41 = arith.addf %38, %40 : vector<2x8x32xf32>
    %42 = vector.extract_strided_slice %33 {offsets = [0, 3, 0, 0], sizes = [2, 1, 8, 32], strides = [1, 1, 1, 1]} : vector<2x4x8x32xf32> to vector<2x1x8x32xf32>
    %43 = vector.shape_cast %42 : vector<2x1x8x32xf32> to vector<2x8x32xf32>
    %44 = arith.addf %41, %43 : vector<2x8x32xf32>
    %c0_21 = arith.constant 0 : index
    %c0_22 = arith.constant 0 : index
    %c0_23 = arith.constant 0 : index
    %45 = vector.load %arg6[%c0_21, %c0_22, %c0_23] : memref<1x1x32xf32, #tpu.memory_space<vmem>>, vector<1x1x32xf32>
    %46 = vector.broadcast %45 : vector<1x1x32xf32> to vector<2x8x32xf32>
    %47 = arith.addf %44, %46 : vector<2x8x32xf32>
    %c0_24 = arith.constant 0 : index
    %c0_25 = arith.constant 0 : index
    %c0_26 = arith.constant 0 : index
    %48 = vector.load %arg7[%c0_24, %c0_25, %c0_26] : memref<2x8x32xf32, #tpu.memory_space<vmem>>, vector<2x8x32xf32>
    tpu.vector_store %arg7[%c0_24, %c0_25, %c0_26], %47 {strides = array<i32>} : memref<2x8x32xf32, #tpu.memory_space<vmem>>, vector<2x8x32xf32>,
    return
  }
  func.func @transform_0(%arg0: i32) -> (i32, i32, i32) {
    %c0_i32 = arith.constant 0 : i32
    %c0_i32_0 = arith.constant 0 : i32
    %c0_i32_1 = arith.constant 0 : i32
    %c0_i32_2 = arith.constant 0 : i32
    return %c0_i32, %c0_i32_0, %c0_i32_1 : i32, i32, i32
  }
  func.func @transform_1(%arg0: i32) -> (i32, i32, i32) {
    %c0_i32 = arith.constant 0 : i32
    %c0_i32_0 = arith.constant 0 : i32
    %c0_i32_1 = arith.constant 0 : i32
    %c0_i32_2 = arith.constant 0 : i32
    return %c0_i32, %c0_i32_0, %c0_i32_1 : i32, i32, i32
  }
  func.func @transform_2(%arg0: i32) -> (i32, i32, i32) {
    %c0_i32 = arith.constant 0 : i32
    %c0_i32_0 = arith.constant 0 : i32
    %c0_i32_1 = arith.constant 0 : i32
    %c0_i32_2 = arith.constant 0 : i32
    return %c0_i32, %c0_i32_0, %c0_i32_1 : i32, i32, i32
  }
  func.func @transform_3(%arg0: i32) -> (i32, i32, i32) {
    %c0_i32 = arith.constant 0 : i32
    %c0_i32_0 = arith.constant 0 : i32
    %c0_i32_1 = arith.constant 0 : i32
    %c0_i32_2 = arith.constant 0 : i32
    return %c0_i32, %c0_i32_0, %c0_i32_1 : i32, i32, i32
  }
  func.func @transform_4(%arg0: i32) -> (i32, i32, i32) {
    %c0_i32 = arith.constant 0 : i32
    %c0_i32_0 = arith.constant 0 : i32
    %c0_i32_1 = arith.constant 0 : i32
    %c0_i32_2 = arith.constant 0 : i32
    return %c0_i32, %c0_i32_0, %c0_i32_1 : i32, i32, i32
  }
  func.func @transform_5(%arg0: i32) -> (i32, i32, i32) {
    %c0_i32 = arith.constant 0 : i32
    %c0_i32_0 = arith.constant 0 : i32
    %c0_i32_1 = arith.constant 0 : i32
    %c0_i32_2 = arith.constant 0 : i32
    return %c0_i32, %c0_i32_0, %c0_i32_1 : i32, i32, i32
  }
  func.func @transform_6(%arg0: i32) -> (i32, i32, i32) {
    %c0_i32 = arith.constant 0 : i32
    %c0_i32_0 = arith.constant 0 : i32
    %c0_i32_1 = arith.constant 0 : i32
    %c0_i32_2 = arith.constant 0 : i32
    return %c0_i32, %c0_i32_0, %c0_i32_1 : i32, i32, i32
  }
}

</mosaic_0001>

<bundles_post_ra>
// kernel: tpu_custom_call.1
= control target key start
LH: loop header
LB: loop body
LE: loop exit
PB: predicated region body
PF: predicated region fallthrough
CT: control target
= control target key end

     0   :  { %v2301_v1 = vmov 0.0   ;;  %vm2302_vm0 = vmmov 0   ;;  %vm133_vm1 = vcmask 261120   ;;  %s2768_s0 = inlined_call_operand.vmem [shape: bf16[8,8,32], index: 0, kind: input, shape index: {}]   ;;  %s2769_s1 = inlined_call_operand.vmem [shape: f32[8,8,8], index: 1, kind: input, shape index: {}]   ;;  %s2770_s2 = inlined_call_operand.vmem [shape: bf16[8,32,24], index: 2, kind: input, shape index: {}]   ;;  %s2771_s3 = inlined_call_operand.vmem [shape: f32[8,1,24], index: 3, kind: input, shape index: {}]   ;;  %s2772_s4 = inlined_call_operand.vmem [shape: bf16[8,8,32], index: 4, kind: input, shape index: {}]   ;;  %s2773_s5 = inlined_call_operand.vmem [shape: f32[1,1,32], index: 5, kind: input, shape index: {}]   ;;  %s2774_s6 = inlined_call_operand.hbm [shape: f32[2,8,32], index: 6, kind: output, shape index: {}]  }
   0x1   :  { %v2229_v0 = vld [vmem:[%s2770_s2] sm:$0xff]   ;;  %2014 = vmatprep.subr.bf16.mxu0 %v2301_v1  ;;  %2022 = vmatprep.subr.bf16.mxu1 %v2301_v1  ;;  %v2230_v2 = vld [vmem:[%s2770_s2 + $0x10] sm:$0xff]   ;;  %v2231_v3 = vld [vmem:[%s2770_s2 + $0x8] sm:$0xff]  }
   0x2   :  { %2015 = vmatpush3.bf16.msra.mxu0 %v2229_v0  ;;  %2018 = vmatprep.mubr.msk.bf16.mxu0 %vm2302_vm0, %v2301_v1  ;;  %v2232_v4 = vld [vmem:[%s2770_s2 + $0x18] sm:$0xff]   ;;  %v25_v5 = vld [vmem:[%s2768_s0] sm:$0xf]  ;;  %v26_v6 = vld [vmem:[%s2768_s0 + $0x4] sm:$0xf] }
   0x3   :  { %2023 = vmatpush3.bf16.msra.mxu1 %v2230_v2  ;;  %2016 = vmatprep.subr.bf16.mxu0 %v2301_v1  ;;  %v2233_v7 = vld [vmem:[%s2770_s2 + $0x20] sm:$0xff]   ;;  %v2234_v8 = vld [vmem:[%s2770_s2 + $0x30] sm:$0xff]   ;;  %v2235_v9 = vld [vmem:[%s2770_s2 + $0x28] sm:$0xff]  }
   0x4   :  { %2024 = vmatprep.subr.bf16.mxu1 %v2301_v1  ;;  %2026 = vmatprep.mubr.msk.bf16.mxu1 %vm2302_vm0, %v2301_v1  ;;  %v2236_v10 = vld [vmem:[%s2770_s2 + $0x38] sm:$0xff]   ;;  %v27_v11 = vld [vmem:[%s2768_s0 + $0x8] sm:$0xf]  ;;  %v28_v12 = vld [vmem:[%s2768_s0 + $0xc] sm:$0xf] }
   0x5   :  { %v2237_v13 = vld [vmem:[%s2770_s2 + $0x40] sm:$0xff]   ;;  %v2238_v14 = vld [vmem:[%s2770_s2 + $0x50] sm:$0xff]   ;;  %v2239_v15 = vld [vmem:[%s2770_s2 + $0x48] sm:$0xff]  }
   0x6   :  { %2017 = vmatpush3.bf16.msra.mxu0 %v2231_v3  ;;  %v2240_v16 = vld [vmem:[%s2770_s2 + $0x58] sm:$0xff]  }
   0x7   :  { %2025 = vmatpush3.bf16.msra.mxu1 %v2232_v4  ;;  %2030 = vmatprep.subr.bf16.mxu0 %v2301_v1 }
   0x8   :  { %2038 = vmatprep.subr.bf16.mxu1 %v2301_v1 }
   0x9   :  { %2019 = vmatmul.mubr.msk.bf16.vlgmr.msra.gmra.mrb[0].mxu0 %vm133_vm1, %v25_v5 }
   0xa   :  { %2027 = vmatmul.mubr.msk.bf16.vlgmr.msra.gmra.mrb[0].mxu1 %vm133_vm1, %v26_v6  ;;  %2031 = vmatpush3.bf16.msra.mxu0 %v2233_v7 }
   0xb   :  { %2039 = vmatpush3.bf16.msra.mxu1 %v2234_v8  ;;  %2032 = vmatprep.subr.bf16.mxu0 %v2301_v1 }
   0xc   :  { %2040 = vmatprep.subr.bf16.mxu1 %v2301_v1  ;;  %2034 = vmatprep.mubr.msk.bf16.mxu0 %vm2302_vm0, %v2301_v1 }
   0xd   :  { %2042 = vmatprep.mubr.msk.bf16.mxu1 %vm2302_vm0, %v2301_v1 }
   0xe   :  { %2033 = vmatpush3.bf16.msra.mxu0 %v2235_v9 }
   0xf   :  { %2041 = vmatpush3.bf16.msra.mxu1 %v2236_v10  ;;  %2046 = vmatprep.subr.bf16.mxu0 %v2301_v1 }
  0x10   :  { %2054 = vmatprep.subr.bf16.mxu1 %v2301_v1 }
  0x11   :  { %2035 = vmatmul.mubr.msk.bf16.vlgmr.msra.gmra.mrb[4].mxu0 %vm133_vm1, %v27_v11 }
  0x12   :  { %2043 = vmatmul.mubr.msk.bf16.vlgmr.msra.gmra.mrb[4].mxu1 %vm133_vm1, %v28_v12  ;;  %2047 = vmatpush3.bf16.msra.mxu0 %v2237_v13 }
  0x13   :  { %2055 = vmatpush3.bf16.msra.mxu1 %v2238_v14  ;;  %2048 = vmatprep.subr.bf16.mxu0 %v2301_v1 }
  0x14   :  { %11 = vsyncpa [#allocation3], 0  ;;  %2056 = vmatprep.subr.bf16.mxu1 %v2301_v1  ;;  %2050 = vmatprep.mubr.msk.bf16.mxu0 %vm2302_vm0, %v2301_v1  ;;  %v29_v17 = vld [vmem:[%s2768_s0 + $0x10] sm:$0xf]  ;;  %v2241_v18 = vld [vmem:[%s2770_s2 + $0x60] sm:$0xff]   ;;  %s2303_s23 = smov 120  }
  0x15   :  { %2058 = vmatprep.mubr.msk.bf16.mxu1 %vm2302_vm0, %v2301_v1  ;;  %v30_v19 = vld [vmem:[%s2768_s0 + $0x14] sm:$0xf]  ;;  %v2243_v21 = vld [vmem:[%s2770_s2 + $0x68] sm:$0xff]   ;;  %v2244_v22 = vld [vmem:[%s2770_s2 + $0x78] sm:$0xff]   ;;  %vm573_vm2 = vcmask 64512   ;;  %vm1088_vm3 = vcmask 1043456  }
  0x16   :  { %2049 = vmatpush3.bf16.msra.mxu0 %v2239_v15  ;;  %v2242_v20 = vld [vmem:[%s2770_s2 + $0x70] sm:$0xff]   ;;  %v31_v23 = vld [vmem:[%s2768_s0 + $0x18] sm:$0xf]  ;;  %v32_v24 = vld [vmem:[%s2768_s0 + $0x1c] sm:$0xf] }
  0x17   :  { %2057 = vmatpush3.bf16.msra.mxu1 %v2240_v16  ;;  %2062 = vmatprep.subr.bf16.mxu0 %v2301_v1  ;;  %v1885_v25 = vld [vmem:[%s2771_s3] ss:$0 sm:$0xff]  ;;  %v1886_v26 = vld [vmem:[%s2771_s3 + $0x1] ss:$0 sm:$0xff]  ;;  %v1887_v39 = vld [vmem:[%s2771_s3 + $0x2] ss:$0 sm:$0xff] }
  0x18   :  { %2070 = vmatprep.subr.bf16.mxu1 %v2301_v1  ;;  %v1888_v40 = vld [vmem:[%s2771_s3 + $0x3] ss:$0 sm:$0xff]  ;;  %v1889_v53 = vld [vmem:[%s2771_s3 + $0x4] ss:$0 sm:$0xff]  ;;  %v1890_v54 = vld [vmem:[%s2771_s3 + $0x5] ss:$0 sm:$0xff] }
  0x19   :  { %2051 = vmatmul.mubr.msk.bf16.vlgmr.msra.gmra.mrb[8].mxu0 %vm133_vm1, %v29_v17  ;;  %v1891_v4 = vld [vmem:[%s2771_s3 + $0x6] ss:$0 sm:$0xff]  ;;  %v1892_v5 = vld [vmem:[%s2771_s3 + $0x7] ss:$0 sm:$0xff]  ;;  %s2304_s3 = smov 112  }
  0x1a   :  { %2059 = vmatmul.mubr.msk.bf16.vlgmr.msra.gmra.mrb[8].mxu1 %vm133_vm1, %v30_v19  ;;  %2063 = vmatpush3.bf16.msra.mxu0 %v2241_v18 }
  0x1b   :  { %2071 = vmatpush3.bf16.msra.mxu1 %v2242_v20  ;;  %2064 = vmatprep.subr.bf16.mxu0 %v2301_v1 }
  0x1c   :  { %2072 = vmatprep.subr.bf16.mxu1 %v2301_v1  ;;  %2066 = vmatprep.mubr.msk.bf16.mxu0 %vm2302_vm0, %v2301_v1 }
  0x1d   :  { %2074 = vmatprep.mubr.msk.bf16.mxu1 %vm2302_vm0, %v2301_v1 }
  0x1e   :  { %2065 = vmatpush3.bf16.msra.mxu0 %v2243_v21 }
  0x1f   :  { %2073 = vmatpush3.bf16.msra.mxu1 %v2244_v22  ;;  %2078 = vmatprep.subr.bf16.mxu0 %v2301_v1 }
  0x20   :  { %2084 = vmatprep.subr.bf16.mxu1 %v2301_v1 }
  0x21   :  { %2067 = vmatmul.mubr.msk.bf16.vlgmr.msra.gmra.mrb[12].mxu0 %vm133_vm1, %v31_v23 }
  0x22   :  { %2075 = vmatmul.mubr.msk.bf16.vlgmr.msra.gmra.mrb[12].mxu1 %vm133_vm1, %v32_v24  ;;  %2080 = vmatprep.mubr.msk.bf16.mxu0 %vm2302_vm0, %v2301_v1 }
  0x23   :  { %2086 = vmatprep.mubr.msk.bf16.mxu1 %vm2302_vm0, %v2301_v1 }
  0xdc   :  { %v171_v27 = vpop.f32.mrb[0].mxu0 }
  0xdd   :  { %v172_v28 = vadd.f32 %v1885_v25, %v171_v27  ;;  %v2020_v29 = vpop.f32.mrb[1].mxu0  ;;  %v226_v30 = vpop.f32.mrb[0].mxu1 }
  0xde   :  { %v227_v31 = vadd.f32 %v1886_v26, %v226_v30  ;;  %v174_v32 = vpop.f32.mrb[2].mxu0  ;;  %v2028_v33 = vpop.f32.mrb[1].mxu1 }
  0xdf   :  { %v2467_v34 = vpack.c.bf16 %v172_v28, %v172_v28  ;;  %v2021_v35 = vpop.f32.mrb[3].mxu0  ;;  %v229_v36 = vpop.f32.mrb[2].mxu1 }
  0xe0   :  { %v2029_v37 = vpop.f32.mrb[3].mxu1  ;;  %v2469_v38 = vpack.c.bf16 %v227_v31, %v227_v31 }
  0xe1   :  { %571 = vrot.lane.b32.xlu0 %v2467_v34, %s2303_s23 }
  0xe4   :  { %v281_v41 = vpop.f32.mrb[4].mxu0 }
  0xe5   :  { %v282_v42 = vadd.f32 %v1887_v39, %v281_v41  ;;  %v336_v43 = vpop.f32.mrb[4].mxu1  ;;  %621 = vrot.lane.b32.xlu0 %v2469_v38, %s2303_s23  ;;  %v2036_v44 = vpop.f32.mrb[5].mxu0  ;;  %v971_v39 = vld [vmem:[%s2769_s1] sm:$0xff] }
  0xe6   :  { %v337_v45 = vadd.f32 %v1888_v40, %v336_v43  ;;  %v284_v46 = vpop.f32.mrb[6].mxu0  ;;  %v2044_v47 = vpop.f32.mrb[5].mxu1 }
  0xe7   :  { %v2481_v48 = vpack.c.bf16 %v282_v42, %v282_v42  ;;  %v2037_v49 = vpop.f32.mrb[7].mxu0  ;;  %v339_v50 = vpop.f32.mrb[6].mxu1  ;;  %v972_v46 = vld [vmem:[%s2769_s1 + $0x8] sm:$0xff] }
  0xe8   :  { %v2045_v51 = vpop.f32.mrb[7].mxu1  ;;  %v2483_v52 = vpack.c.bf16 %v337_v45, %v337_v45 }
  0xe9   :  { %670 = vrot.lane.b32.xlu1 %v2481_v48, %s2303_s23 }
  0xec   :  { %v391_v55 = vpop.f32.mrb[8].mxu0 }
  0xed   :  { %v392_v56 = vadd.f32 %v1889_v53, %v391_v55  ;;  %719 = vrot.lane.b32.xlu1 %v2483_v52, %s2303_s23  ;;  %v446_v57 = vpop.f32.mrb[8].mxu1  ;;  %v2052_v58 = vpop.f32.mrb[9].mxu0 }
  0xee   :  { %v447_v59 = vadd.f32 %v1890_v54, %v446_v57  ;;  %v2060_v60 = vpop.f32.mrb[9].mxu1  ;;  %v394_v61 = vpop.f32.mrb[10].mxu0 }
  0xef   :  { %v2495_v62 = vpack.c.bf16 %v392_v56, %v392_v56  ;;  %v449_v63 = vpop.f32.mrb[10].mxu1  ;;  %v2053_v0 = vpop.f32.mrb[11].mxu0  ;;  %v973_v56 = vld [vmem:[%s2769_s1 + $0x10] sm:$0xff] }
  0xf0   :  { %v2497_v2 = vpack.c.bf16 %v447_v59, %v447_v59  ;;  %v2061_v3 = vpop.f32.mrb[11].mxu1 }
  0xf1   :  { %768 = vrot.lane.b32.xlu0 %v2495_v62, %s2303_s23  ;;  %v974_v3 = vld [vmem:[%s2769_s1 + $0x18] sm:$0xff] }
  0xf2   :  { %817 = vrot.lane.b32.xlu1 %v2497_v2, %s2303_s23 }
  0xf4   :  { %v501_v6 = vpop.f32.mrb[12].mxu0 }
  0xf5   :  { %v502_v7 = vadd.f32 %v1891_v4, %v501_v6  ;;  %v556_v8 = vpop.f32.mrb[12].mxu1  ;;  %v2068_v9 = vpop.f32.mrb[13].mxu0 }
  0xf6   :  { %v557_v10 = vadd.f32 %v1892_v5, %v556_v8  ;;  %v504_v11 = vpop.f32.mrb[14].mxu0  ;;  %v2076_v12 = vpop.f32.mrb[13].mxu1 }
  0xf7   :  { %v2509_v13 = vpack.c.bf16 %v502_v7, %v502_v7  ;;  %v2069_v14 = vpop.f32.mrb[15].mxu0  ;;  %v559_v15 = vpop.f32.mrb[14].mxu1  ;;  %v975_v11 = vld [vmem:[%s2769_s1 + $0x20] sm:$0xff] }
  0xf8   :  { %v2511_v16 = vpack.c.bf16 %v557_v10, %v557_v10  ;;  %v2077_v17 = vpop.f32.mrb[15].mxu1 }
  0xf9   :  { %866 = vrot.lane.b32.xlu0 %v2509_v13, %s2303_s23 }
  0xfa   :  { %915 = vrot.lane.b32.xlu1 %v2511_v16, %s2303_s23 }
  0xfd   :  { %1083 = vrot.lane.b32.xlu0 %v2467_v34, %s2304_s3 }
  0xfe   :  { %1132 = vrot.lane.b32.xlu1 %v2469_v38, %s2304_s3 }
 0x153   :  { %v572_v18 = vpop.permute.xlu0 %571 }
 0x154   :  { %v578_v19 = vsel %vm573_vm2, %v572_v18, 0 }
 0x155   :  { %2079 = vmatpush3.bf16.xpose.msra.mxu0 %v578_v19 }
 0x156   :  { %2090 = vmatprep.subr.bf16.mxu0 %v2301_v1 }
 0x157   :  { %v622_v20 = vpop.permute.xlu0 %621 }
 0x158   :  { %v627_v21 = vsel %vm573_vm2, %v622_v20, 0 }
 0x159   :  { %2085 = vmatpush3.bf16.xpose.msra.mxu1 %v627_v21  ;;  %v976_v21 = vld [vmem:[%s2769_s1 + $0x28] sm:$0xff] }
 0x15a   :  { %2096 = vmatprep.subr.bf16.mxu1 %v2301_v1 }
 0x15b   :  { %v671_v22 = vpop.permute.xlu1 %670 }
 0x15c   :  { %v676_v23 = vsel %vm573_vm2, %v671_v22, 0  ;;  %2081 = vmatmul.mubr.msk.bf16.vlgmr.msra.gmra.mrb[16].mxu0 %vm573_vm2, %v2467_v34 }
 0x15d   :  { %2091 = vmatpush3.bf16.xpose.msra.mxu0 %v676_v23  ;;  %2092 = vmatprep.mubr.msk.bf16.mxu0 %vm2302_vm0, %v2301_v1 }
 0x15e   :  { %2102 = vmatprep.subr.bf16.mxu0 %v2301_v1 }
 0x15f   :  { %v720_v24 = vpop.permute.xlu1 %719 }
 0x160   :  { %v725_v25 = vsel %vm573_vm2, %v720_v24, 0  ;;  %2087 = vmatmul.mubr.msk.bf16.vlgmr.msra.gmra.mrb[16].mxu1 %vm573_vm2, %v2469_v38 }
 0x161   :  { %2097 = vmatpush3.bf16.xpose.msra.mxu1 %v725_v25  ;;  %2098 = vmatprep.mubr.msk.bf16.mxu1 %vm2302_vm0, %v2301_v1 }
 0x162   :  { %2108 = vmatprep.subr.bf16.mxu1 %v2301_v1 }
 0x163   :  { %v769_v26 = vpop.permute.xlu0 %768 }
 0x164   :  { %v774_v27 = vsel %vm573_vm2, %v769_v26, 0  ;;  %2093 = vmatmul.mubr.msk.bf16.vlgmr.msra.gmra.mrb[20].mxu0 %vm573_vm2, %v2481_v48  ;;  %v818_v28 = vpop.permute.xlu1 %817 }
 0x165   :  { %2103 = vmatpush3.bf16.xpose.msra.mxu0 %v774_v27  ;;  %2104 = vmatprep.mubr.msk.bf16.mxu0 %vm2302_vm0, %v2301_v1  ;;  %v823_v29 = vsel %vm573_vm2, %v818_v28, 0 }
 0x166   :  { %2114 = vmatprep.subr.bf16.mxu0 %v2301_v1 }
 0x168   :  { %2099 = vmatmul.mubr.msk.bf16.vlgmr.msra.gmra.mrb[20].mxu1 %vm573_vm2, %v2483_v52 }
 0x169   :  { %2109 = vmatpush3.bf16.xpose.msra.mxu1 %v823_v29  ;;  %2110 = vmatprep.mubr.msk.bf16.mxu1 %vm2302_vm0, %v2301_v1  ;;  %v977_v29 = vld [vmem:[%s2769_s1 + $0x30] sm:$0xff] }
 0x16a   :  { %2120 = vmatprep.subr.bf16.mxu1 %v2301_v1 }
 0x16b   :  { %v867_v30 = vpop.permute.xlu0 %866 }
 0x16c   :  { %v872_v31 = vsel %vm573_vm2, %v867_v30, 0  ;;  %2105 = vmatmul.mubr.msk.bf16.vlgmr.msra.gmra.mrb[24].mxu0 %vm573_vm2, %v2495_v62  ;;  %v916_v32 = vpop.permute.xlu1 %915 }
 0x16d   :  { %2115 = vmatpush3.bf16.xpose.msra.mxu0 %v872_v31  ;;  %2116 = vmatprep.mubr.msk.bf16.mxu0 %vm2302_vm0, %v2301_v1  ;;  %v921_v33 = vsel %vm573_vm2, %v916_v32, 0 }
 0x16e   :  { %2126 = vmatprep.subr.bf16.mxu0 %v2301_v1 }
 0x16f   :  { %v1084_v34 = vpop.permute.xlu0 %1083 }
 0x170   :  { %2111 = vmatmul.mubr.msk.bf16.vlgmr.msra.gmra.mrb[24].mxu1 %vm573_vm2, %v2497_v2  ;;  %v1090_v35 = vsel %vm1088_vm3, %v1084_v34, 0  ;;  %v1133_v36 = vpop.permute.xlu1 %1132 }
 0x171   :  { %2121 = vmatpush3.bf16.xpose.msra.mxu1 %v921_v33  ;;  %2122 = vmatprep.mubr.msk.bf16.mxu1 %vm2302_vm0, %v2301_v1  ;;  %v1138_v37 = vsel %vm1088_vm3, %v1133_v36, 0 }
 0x172   :  { %2132 = vmatprep.subr.bf16.mxu1 %v2301_v1 }
 0x174   :  { %2117 = vmatmul.mubr.msk.bf16.vlgmr.msra.gmra.mrb[28].mxu0 %vm573_vm2, %v2509_v13 }
 0x175   :  { %2127 = vmatpush3.bf16.msra.mxu0 %v1090_v35  ;;  %2128 = vmatprep.mubr.msk.bf16.mxu0 %vm2302_vm0, %v2301_v1 }
 0x176   :  { %2138 = vmatprep.subr.bf16.mxu0 %v2301_v1 }
 0x178   :  { %2123 = vmatmul.mubr.msk.bf16.vlgmr.msra.gmra.mrb[28].mxu1 %vm573_vm2, %v2511_v16 }
 0x179   :  { %2133 = vmatpush3.bf16.msra.mxu1 %v1138_v37  ;;  %2134 = vmatprep.mubr.msk.bf16.mxu1 %vm2302_vm0, %v2301_v1  ;;  %v978_v37 = vld [vmem:[%s2769_s1 + $0x38] sm:$0xff] }
 0x17a   :  { %2144 = vmatprep.subr.bf16.mxu1 %v2301_v1 }
 0x22f   :  { %v614_v38 = vpop.f32.mrb[16].mxu0 }
 0x230   :  { %v963_v40 = vmul.f32 0.35355338, %v614_v38  ;;  %v2082_v41 = vpop.f32.mrb[17].mxu0 }
 0x231   :  { %v617_v42 = vpop.f32.mrb[18].mxu0 }
 0x232   :  { %v2083_v43 = vpop.f32.mrb[19].mxu0  ;;  %v2576_v44 = vadd.f32 %v971_v39, %v963_v40 }
 0x233   :  { %v663_v45 = vpop.f32.mrb[16].mxu1 }
 0x234   :  { %v964_v47 = vmul.f32 0.35355338, %v663_v45  ;;  %v2088_v49 = vpop.f32.mrb[17].mxu1  ;;  %v987_v50 = vsel %vm573_vm2, %v2576_v44, -inf }
 0x235   :  { %v666_v51 = vpop.f32.mrb[18].mxu1  ;;  %988 = vmax.xlane.f32.xlu0 %v987_v50 }
 0x236   :  { %v2089_v53 = vpop.f32.mrb[19].mxu1  ;;  %v2583_v54 = vadd.f32 %v972_v46, %v964_v47 }
 0x237   :  { %v712_v55 = vpop.f32.mrb[20].mxu0 }
 0x238   :  { %v965_v57 = vmul.f32 0.35355338, %v712_v55  ;;  %v2094_v58 = vpop.f32.mrb[21].mxu0  ;;  %v990_v59 = vsel %vm573_vm2, %v2583_v54, -inf }
 0x239   :  { %991 = vmax.xlane.f32.xlu1 %v990_v59  ;;  %v715_v60 = vpop.f32.mrb[22].mxu0 }
 0x23a   :  { %v2095_v61 = vpop.f32.mrb[23].mxu0  ;;  %v981_v63 = vadd.f32 %v973_v56, %v965_v57 }
 0x23b   :  { %v761_v0 = vpop.f32.mrb[20].mxu1 }
 0x23c   :  { %v966_v4 = vmul.f32 0.35355338, %v761_v0  ;;  %v2100_v5 = vpop.f32.mrb[21].mxu1  ;;  %v993_v6 = vsel %vm573_vm2, %v981_v63, -inf }
 0x23d   :  { %v764_v7 = vpop.f32.mrb[22].mxu1  ;;  %994 = vmax.xlane.f32.xlu0 %v993_v6 }
 0x23e   :  { %v2101_v8 = vpop.f32.mrb[23].mxu1  ;;  %v982_v9 = vadd.f32 %v974_v3, %v966_v4 }
 0x23f   :  { %v810_v10 = vpop.f32.mrb[24].mxu0 }
 0x240   :  { %v967_v12 = vmul.f32 0.35355338, %v810_v10  ;;  %v2106_v14 = vpop.f32.mrb[25].mxu0  ;;  %v996_v15 = vsel %vm573_vm2, %v982_v9, -inf }
 0x241   :  { %997 = vmax.xlane.f32.xlu0 %v996_v15  ;;  %v813_v17 = vpop.f32.mrb[26].mxu0 }
 0x242   :  { %v2107_v18 = vpop.f32.mrb[27].mxu0  ;;  %v2598_v19 = vadd.f32 %v975_v11, %v967_v12 }
 0x243   :  { %v859_v20 = vpop.f32.mrb[24].mxu1 }
 0x244   :  { %v968_v22 = vmul.f32 0.35355338, %v859_v20  ;;  %v2112_v23 = vpop.f32.mrb[25].mxu1  ;;  %v999_v24 = vsel %vm573_vm2, %v2598_v19, -inf }
 0x245   :  { %v862_v25 = vpop.f32.mrb[26].mxu1  ;;  %1000 = vmax.xlane.f32.xlu1 %v999_v24 }
 0x246   :  { %v2113_v26 = vpop.f32.mrb[27].mxu1  ;;  %v984_v27 = vadd.f32 %v976_v21, %v968_v22 }
 0x247   :  { %v908_v28 = vpop.f32.mrb[28].mxu0 }
 0x248   :  { %v969_v30 = vmul.f32 0.35355338, %v908_v28  ;;  %v2118_v31 = vpop.f32.mrb[29].mxu0  ;;  %v1002_v32 = vsel %vm573_vm2, %v984_v27, -inf }
 0x249   :  { %1003 = vmax.xlane.f32.xlu0 %v1002_v32  ;;  %v911_v33 = vpop.f32.mrb[30].mxu0 }
 0x24a   :  { %v2119_v34 = vpop.f32.mrb[31].mxu0  ;;  %v985_v35 = vadd.f32 %v977_v29, %v969_v30 }
 0x24b   :  { %v957_v36 = vpop.f32.mrb[28].mxu1 }
 0x24c   :  { %v970_v38 = vmul.f32 0.35355338, %v957_v36  ;;  %v2124_v39 = vpop.f32.mrb[29].mxu1  ;;  %v1005_v40 = vsel %vm573_vm2, %v985_v35, -inf }
 0x24d   :  { %v960_v41 = vpop.f32.mrb[30].mxu1  ;;  %1006 = vmax.xlane.f32.xlu1 %v1005_v40 }
 0x24e   :  { %v2125_v42 = vpop.f32.mrb[31].mxu1  ;;  %v986_v43 = vadd.f32 %v978_v37, %v970_v38 }
 0x250   :  { %v1008_v45 = vsel %vm573_vm2, %v986_v43, -inf }
 0x251   :  { %1009 = vmax.xlane.f32.xlu0 %v1008_v45 }
 0x25e   :  { %1228 = vrot.lane.b32.xlu1 %v2483_v52, %s2304_s3 }
 0x267   :  { %1180 = vrot.lane.b32.xlu0 %v2481_v48, %s2304_s3 }
 0x2c2   :  { %v989_v46 = vpop.xlane.xlu0 %988 }
 0x2c3   :  { %v1011_v47 = vsub.f32 %v2576_v44, %v989_v46 }
 0x2c5   :  { %v1019_v49 = vmul.f32 1.442695, %v1011_v47 }
 0x2c6   :  { %v992_v50 = vpop.xlane.xlu1 %991 }
 0x2c7   :  { %2245 = vpow2.f32 %v1019_v49  ;;  %v1012_v51 = vsub.f32 %v2583_v54, %v992_v50 }
 0x2c9   :  { %v1021_v53 = vmul.f32 1.442695, %v1012_v51 }
 0x2ca   :  { %v995_v55 = vpop.xlane.xlu0 %994 }
 0x2cb   :  { %2247 = vpow2.f32 %v1021_v53  ;;  %v1013_v56 = vsub.f32 %v981_v63, %v995_v55 }
 0x2cd   :  { %v1023_v57 = vmul.f32 1.442695, %v1013_v56 }
 0x2ce   :  { %v998_v58 = vpop.xlane.xlu0 %997 }
 0x2cf   :  { %2249 = vpow2.f32 %v1023_v57  ;;  %v1014_v59 = vsub.f32 %v982_v9, %v998_v58 }
 0x2d1   :  { %v2246_v52 = vpop.eup %2245  ;;  %v1025_v60 = vmul.f32 1.442695, %v1014_v59 }
 0x2d2   :  { %v1035_v48 = vsel %vm573_vm2, %v2246_v52, 0.0  ;;  %v1001_v4 = vpop.xlane.xlu1 %1000 }
 0x2d3   :  { %2251 = vpow2.f32 %v1025_v60  ;;  %1036 = vadd.xlane.f32.xlu1 %v1035_v48  ;;  %v1015_v5 = vsub.f32 %v2598_v19, %v1001_v4 }
 0x2d5   :  { %v2248_v44 = vpop.eup %2247  ;;  %v1027_v9 = vmul.f32 1.442695, %v1015_v5  ;;  %v1476_v5 = vld [vmem:[%s2772_s4] sm:$0xf] }
 0x2d6   :  { %v1038_v61 = vsel %vm573_vm2, %v2248_v44, 0.0  ;;  %v1004_v6 = vpop.xlane.xlu0 %1003 }
 0x2d7   :  { %1039 = vadd.xlane.f32.xlu0 %v1038_v61  ;;  %v1016_v8 = vsub.f32 %v984_v27, %v1004_v6  ;;  %2253 = vpow2.f32 %v1027_v9  ;;  %v1488_v6 = vsel %vm1088_vm3, %v1476_v5, 0  ;;  %v1478_v9 = vld [vmem:[%s2772_s4 + $0x8] sm:$0xf] }
 0x2d9   :  { %v2250_v0 = vpop.eup %2249  ;;  %v1029_v12 = vmul.f32 1.442695, %v1016_v8 }
 0x2da   :  { %v1041_v54 = vsel %vm573_vm2, %v2250_v0, 0.0  ;;  %v1007_v7 = vpop.xlane.xlu1 %1006 }
 0x2db   :  { %1042 = vadd.xlane.f32.xlu1 %v1041_v54  ;;  %v1017_v10 = vsub.f32 %v985_v35, %v1007_v7  ;;  %2255 = vpow2.f32 %v1029_v12  ;;  %v1477_v7 = vld [vmem:[%s2772_s4 + $0x4] sm:$0xf] }
 0x2dc   :  { %v1534_v8 = vsel %vm1088_vm3, %v1477_v7, 0 }
 0x2dd   :  { %v2623_v3 = vpop.eup %2251  ;;  %v1031_v14 = vmul.f32 1.442695, %v1017_v10 }
 0x2de   :  { %v1044_v63 = vsel %vm573_vm2, %v2623_v3, 0.0  ;;  %v1010_v11 = vpop.xlane.xlu0 %1009  ;;  %v1229_v24 = vpop.permute.xlu1 %1228 }
 0x2df   :  { %1045 = vadd.xlane.f32.xlu0 %v1044_v63  ;;  %v1018_v15 = vsub.f32 %v986_v43, %v1010_v11  ;;  %2257 = vpow2.f32 %v1031_v14  ;;  %v1234_v36 = vsel %vm1088_vm3, %v1229_v24, 0  ;;  %v1580_v14 = vsel %vm1088_vm3, %v1478_v9, 0 }
 0x2e1   :  { %v1033_v17 = vmul.f32 1.442695, %v1018_v15 }
 0x2e2   :  { %v1181_v25 = vpop.permute.xlu0 %1180 }
 0x2e3   :  { %2259 = vpow2.f32 %v1033_v17  ;;  %v1186_v34 = vsel %vm1088_vm3, %v1181_v25, 0  ;;  %v1479_v17 = vld [vmem:[%s2772_s4 + $0xc] sm:$0xf] }
 0x2ec   :  { %1324 = vrot.lane.b32.xlu1 %v2497_v2, %s2304_s3  ;;  %v2632_v2 = vpop.eup %2253 }
 0x2ed   :  { %v1047_v18 = vsel %vm573_vm2, %v2632_v2, 0.0 }
 0x2f5   :  { %1276 = vrot.lane.b32.xlu0 %v2495_v62, %s2304_s3  ;;  %v2634_v62 = vpop.eup %2255 }
 0x2f6   :  { %v2638_v19 = vpop.eup %2257  ;;  %v1050_v20 = vsel %vm573_vm2, %v2634_v62, 0.0 }
 0x2f7   :  { %v1053_v21 = vsel %vm573_vm2, %v2638_v19, 0.0  ;;  %v2644_v22 = vpop.eup %2259 }
 0x2f8   :  { %v1056_v23 = vsel %vm573_vm2, %v2644_v22, 0.0 }
 0x310   :  { %1048 = vadd.xlane.f32.xlu1 %v1047_v18 }
 0x314   :  { %1051 = vadd.xlane.f32.xlu0 %v1050_v20  ;;  %1054 = vadd.xlane.f32.xlu1 %v1053_v21  ;;  %v1626_v20 = vsel %vm1088_vm3, %v1479_v17, 0 }
 0x318   :  { %1057 = vadd.xlane.f32.xlu1 %v1056_v23 }
 0x329   :  { %1420 = vrot.lane.b32.xlu1 %v2511_v16, %s2304_s3 }
 0x32a   :  { %1372 = vrot.lane.b32.xlu0 %v2509_v13, %s2304_s3 }
 0x360   :  { %v1037_v26 = vpop.xlane.xlu1 %1036 }
 0x361   :  { %2261 = vrcp.f32 %v1037_v26 }
 0x364   :  { %v1040_v27 = vpop.xlane.xlu0 %1039 }
 0x365   :  { %2263 = vrcp.f32 %v1040_v27 }
 0x368   :  { %v1043_v28 = vpop.xlane.xlu1 %1042 }
 0x369   :  { %2265 = vrcp.f32 %v1043_v28 }
 0x36b   :  { %v2262_v29 = vpop.eup %2261 }
 0x36c   :  { %v1060_v30 = vmul.f32 %v2262_v29, %v2246_v52  ;;  %v1046_v31 = vpop.xlane.xlu0 %1045  ;;  %v1325_v43 = vpop.permute.xlu1 %1324  ;;  %v1481_v29 = vld [vmem:[%s2772_s4 + $0x14] sm:$0xf] }
 0x36d   :  { %2267 = vrcp.f32 %v1046_v31  ;;  %v1330_v46 = vsel %vm1088_vm3, %v1325_v43, 0 }
 0x36e   :  { %v1075_v32 = vpack.c.bf16 %v1060_v30, %v1060_v30 }
 0x36f   :  { %v2264_v33 = vpop.eup %2263 }
 0x370   :  { %v1062_v16 = vmul.f32 %v2264_v33, %v2248_v44  ;;  %2129 = vmatmul.mubr.msk.bf16.vlgmr.msra.gmra.mrb[32].mxu0 %vm573_vm2, %v1075_v32  ;;  %v1277_v38 = vpop.permute.xlu0 %1276 }
 0x371   :  { %2139 = vmatpush3.bf16.msra.mxu0 %v1186_v34  ;;  %2140 = vmatprep.mubr.msk.bf16.mxu0 %vm2302_vm0, %v2301_v1  ;;  %v1282_v42 = vsel %vm1088_vm3, %v1277_v38, 0  ;;  %v1718_v34 = vsel %vm1088_vm3, %v1481_v29, 0 }
 0x372   :  { %v1076_v13 = vpack.c.bf16 %v1062_v16, %v1062_v16  ;;  %2150 = vmatprep.subr.bf16.mxu0 %v2301_v1 }
 0x373   :  { %v2266_v35 = vpop.eup %2265 }
 0x374   :  { %v1064_v37 = vmul.f32 %v2266_v35, %v2250_v0  ;;  %2135 = vmatmul.mubr.msk.bf16.vlgmr.msra.gmra.mrb[32].mxu1 %vm573_vm2, %v1076_v13  ;;  %v1482_v35 = vld [vmem:[%s2772_s4 + $0x18] sm:$0xf] }
 0x375   :  { %2145 = vmatpush3.bf16.msra.mxu1 %v1234_v36  ;;  %2146 = vmatprep.mubr.msk.bf16.mxu1 %vm2302_vm0, %v2301_v1 }
 0x376   :  { %v1077_v39 = vpack.c.bf16 %v1064_v37, %v1064_v37  ;;  %2156 = vmatprep.subr.bf16.mxu1 %v2301_v1 }
 0x377   :  { %v2268_v40 = vpop.eup %2267 }
 0x378   :  { %v1066_v41 = vmul.f32 %v2268_v40, %v2623_v3  ;;  %2141 = vmatmul.mubr.msk.bf16.vlgmr.msra.gmra.mrb[36].mxu0 %vm573_vm2, %v1077_v39  ;;  %v1764_v39 = vsel %vm1088_vm3, %v1482_v35, 0 }
 0x379   :  { %2151 = vmatpush3.bf16.msra.mxu0 %v1282_v42  ;;  %2152 = vmatprep.mubr.msk.bf16.mxu0 %vm2302_vm0, %v2301_v1 }
 0x37a   :  { %v1078_v45 = vpack.c.bf16 %v1066_v41, %v1066_v41  ;;  %2162 = vmatprep.subr.bf16.mxu0 %v2301_v1  ;;  %v1483_v41 = vld [vmem:[%s2772_s4 + $0x1c] sm:$0xf] }
 0x37c   :  { %2147 = vmatmul.mubr.msk.bf16.vlgmr.msra.gmra.mrb[36].mxu1 %vm573_vm2, %v1078_v45 }
 0x37d   :  { %2157 = vmatpush3.bf16.msra.mxu1 %v1330_v46  ;;  %2158 = vmatprep.mubr.msk.bf16.mxu1 %vm2302_vm0, %v2301_v1 }
 0x37e   :  { %2168 = vmatprep.subr.bf16.mxu1 %v2301_v1 }
 0x39d   :  { %v1049_v47 = vpop.xlane.xlu1 %1048 }
 0x39e   :  { %2269 = vrcp.f32 %v1049_v47  ;;  %v1810_v47 = vsel %vm1088_vm3, %v1483_v41, 0 }
 0x3a1   :  { %v1052_v49 = vpop.xlane.xlu0 %1051  ;;  %v1055_v50 = vpop.xlane.xlu1 %1054 }
 0x3a2   :  { %2271 = vrcp.f32 %v1052_v49 }
 0x3a3   :  { %2273 = vrcp.f32 %v1055_v50 }
 0x3a5   :  { %v1058_v51 = vpop.xlane.xlu1 %1057  ;;  %v1373_v56 = vpop.permute.xlu0 %1372 }
 0x3a6   :  { %2275 = vrcp.f32 %v1058_v51  ;;  %v1378_v60 = vsel %vm1088_vm3, %v1373_v56, 0 }
 0x3a8   :  { %v2270_v53 = vpop.eup %2269 }
 0x3a9   :  { %v1068_v55 = vmul.f32 %v2270_v53, %v2632_v2  ;;  %v1421_v48 = vpop.permute.xlu1 %1420 }
 0x3aa   :  { %v1426_v54 = vsel %vm1088_vm3, %v1421_v48, 0 }
 0x3ab   :  { %v1079_v57 = vpack.c.bf16 %v1068_v55, %v1068_v55 }
 0x3ac   :  { %v2272_v58 = vpop.eup %2271 }
 0x3ad   :  { %v2274_v59 = vpop.eup %2273  ;;  %v1070_v52 = vmul.f32 %v2272_v58, %v2634_v62  ;;  %2153 = vmatmul.mubr.msk.bf16.vlgmr.msra.gmra.mrb[40].mxu0 %vm573_vm2, %v1079_v57 }
 0x3ae   :  { %2163 = vmatpush3.bf16.msra.mxu0 %v1378_v60  ;;  %2164 = vmatprep.mubr.msk.bf16.mxu0 %vm2302_vm0, %v2301_v1  ;;  %v1072_v44 = vmul.f32 %v2274_v59, %v2638_v19 }
 0x3af   :  { %v1080_v61 = vpack.c.bf16 %v1070_v52, %v1070_v52  ;;  %2174 = vmatprep.subr.bf16.mxu0 %v2301_v1 }
 0x3b0   :  { %v2276_v0 = vpop.eup %2275  ;;  %v1081_v63 = vpack.c.bf16 %v1072_v44, %v1072_v44 }
 0x3b1   :  { %2159 = vmatmul.mubr.msk.bf16.vlgmr.msra.gmra.mrb[40].mxu1 %vm573_vm2, %v1080_v61  ;;  %v1074_v3 = vmul.f32 %v2276_v0, %v2644_v22  ;;  %v1480_v22 = vld [vmem:[%s2772_s4 + $0x10] sm:$0xf] }
 0x3b2   :  { %2169 = vmatpush3.bf16.msra.mxu1 %v1426_v54  ;;  %2170 = vmatprep.mubr.msk.bf16.mxu1 %vm2302_vm0, %v2301_v1  ;;  %v1672_v27 = vsel %vm1088_vm3, %v1480_v22, 0 }
 0x3b3   :  { %2180 = vmatprep.subr.bf16.mxu1 %v2301_v1  ;;  %v1082_v4 = vpack.c.bf16 %v1074_v3, %v1074_v3 }
 0x3b5   :  { %2165 = vmatmul.mubr.msk.bf16.vlgmr.msra.gmra.mrb[44].mxu0 %vm573_vm2, %v1081_v63 }
 0x3b6   :  { %2176 = vmatprep.mubr.msk.bf16.mxu0 %vm2302_vm0, %v2301_v1  ;;  %2175 = vmatpush3.bf16.msra.mxu0 %v1488_v6 }
 0x3b7   :  { %2186 = vmatprep.subr.bf16.mxu0 %v2301_v1 }
 0x3b9   :  { %2171 = vmatmul.mubr.msk.bf16.vlgmr.msra.gmra.mrb[44].mxu1 %vm573_vm2, %v1082_v4 }
 0x3ba   :  { %2182 = vmatprep.mubr.msk.bf16.mxu1 %vm2302_vm0, %v2301_v1  ;;  %2181 = vmatpush3.bf16.msra.mxu1 %v1534_v8 }
 0x3bb   :  { %2192 = vmatprep.subr.bf16.mxu1 %v2301_v1 }
 0x443   :  { %v1126_v10 = vpop.f32.mrb[32].mxu0 }
 0x444   :  { %v1468_v11 = vpack.c.bf16 %v1126_v10, %v1126_v10  ;;  %v2130_v12 = vpop.f32.mrb[33].mxu0 }
 0x445   :  { %v1129_v15 = vpop.f32.mrb[34].mxu0  ;;  %v1941_v12 = vld [vmem:[%s2773_s5] ss:$0 sm:$0xff]  ;;  %s2305_s5 = smov [#allocation2]  }
 0x446   :  { %v2131_v2 = vpop.f32.mrb[35].mxu0  ;;  %2177 = vmatmul.mubr.msk.bf16.vlgmr.msra.gmra.mrb[48].mxu0 %vm573_vm2, %v1468_v11  ;;  %s1874_s17 = sshll.u32 %s2305_s5, 4  ;;  %s1875_s17 = int_to_ptr.vmem [resolvable:$true] %s1874_s17 }
 0x447   :  { %v1174_v62 = vpop.f32.mrb[32].mxu1  ;;  %2187 = vmatpush3.bf16.msra.mxu0 %v1580_v14  ;;  %2188 = vmatprep.mubr.msk.bf16.mxu0 %vm2302_vm0, %v2301_v1  ;;  %s2277_s18 = scalar_lea.vmem %s1875_s17, 256  ;;  %p2282_p1 = scmp.lt.s32.totalorder %s1875_s17, %s1875_s17 }
 0x448   :  { %v1469_v18 = vpack.c.bf16 %v1174_v62, %v1174_v62  ;;  %v2136_v19 = vpop.f32.mrb[33].mxu1  ;;  %2198 = vmatprep.subr.bf16.mxu0 %v2301_v1  ;;  %p2278_p0 = scmp.ne.s32.totalorder %s1875_s17, %s2277_s18  ;;  %p2283_p2 = scmp.lt.s32.totalorder %s2277_s18, %s2277_s18 }
 0x449   :  { %v1177_v21 = vpop.f32.mrb[34].mxu1 }
 0x44a   :  { %v2137_v23 = vpop.f32.mrb[35].mxu1  ;;  %2183 = vmatmul.mubr.msk.bf16.vlgmr.msra.gmra.mrb[48].mxu1 %vm573_vm2, %v1469_v18  ;;  %p2284_p3 = por %p2283_p2, %p2282_p1 }
 0x44b   :  { %v1222_v24 = vpop.f32.mrb[36].mxu0  ;;  %2193 = vmatpush3.bf16.msra.mxu1 %v1626_v20  ;;  %2194 = vmatprep.mubr.msk.bf16.mxu1 %vm2302_vm0, %v2301_v1 }
 0x44c   :  { %v1470_v25 = vpack.c.bf16 %v1222_v24, %v1222_v24  ;;  %v2142_v26 = vpop.f32.mrb[37].mxu0  ;;  %2204 = vmatprep.subr.bf16.mxu1 %v2301_v1  ;;  %p2285_p4 = pnand %p2284_p3, %p2278_p0 }
 0x44d   :  { %v1225_v28 = vpop.f32.mrb[38].mxu0 }
 0x44e   :  { %v2143_v30 = vpop.f32.mrb[39].mxu0  ;;  %2189 = vmatmul.mubr.msk.bf16.vlgmr.msra.gmra.mrb[52].mxu0 %vm573_vm2, %v1470_v25 }
 0x44f   :  { %v1270_v31 = vpop.f32.mrb[36].mxu1  ;;  %2199 = vmatpush3.bf16.msra.mxu0 %v1672_v27  ;;  %2200 = vmatprep.mubr.msk.bf16.mxu0 %vm2302_vm0, %v2301_v1 }
 0x450   :  { %v1471_v32 = vpack.c.bf16 %v1270_v31, %v1270_v31  ;;  %v2148_v33 = vpop.f32.mrb[37].mxu1  ;;  %2210 = vmatprep.subr.bf16.mxu0 %v2301_v1 }
 0x451   :  { %v1273_v16 = vpop.f32.mrb[38].mxu1 }
 0x452   :  { %v2149_v13 = vpop.f32.mrb[39].mxu1  ;;  %2195 = vmatmul.mubr.msk.bf16.vlgmr.msra.gmra.mrb[52].mxu1 %vm573_vm2, %v1471_v32 }
 0x453   :  { %2205 = vmatpush3.bf16.msra.mxu1 %v1718_v34  ;;  %2206 = vmatprep.mubr.msk.bf16.mxu1 %vm2302_vm0, %v2301_v1 }
 0x454   :  { %2216 = vmatprep.subr.bf16.mxu1 %v2301_v1 }
 0x480   :  { %v1318_v36 = vpop.f32.mrb[40].mxu0 }
 0x481   :  { %v1472_v37 = vpack.c.bf16 %v1318_v36, %v1318_v36  ;;  %v2154_v38 = vpop.f32.mrb[41].mxu0 }
 0x482   :  { %v1321_v40 = vpop.f32.mrb[42].mxu0 }
 0x483   :  { %v2155_v42 = vpop.f32.mrb[43].mxu0  ;;  %2201 = vmatmul.mubr.msk.bf16.vlgmr.msra.gmra.mrb[56].mxu0 %vm573_vm2, %v1472_v37 }
 0x484   :  { %v1366_v43 = vpop.f32.mrb[40].mxu1  ;;  %2211 = vmatpush3.bf16.msra.mxu0 %v1764_v39  ;;  %2212 = vmatprep.mubr.msk.bf16.mxu0 %vm2302_vm0, %v2301_v1 }
 0x485   :  { %v1473_v45 = vpack.c.bf16 %v1366_v43, %v1366_v43  ;;  %v2160_v46 = vpop.f32.mrb[41].mxu1 }
 0x486   :  { %v1369_v49 = vpop.f32.mrb[42].mxu1 }
 0x487   :  { %v2161_v50 = vpop.f32.mrb[43].mxu1  ;;  %2207 = vmatmul.mubr.msk.bf16.vlgmr.msra.gmra.mrb[56].mxu1 %vm573_vm2, %v1473_v45 }
 0x488   :  { %v1414_v51 = vpop.f32.mrb[44].mxu0  ;;  %2217 = vmatpush3.bf16.msra.mxu1 %v1810_v47  ;;  %2218 = vmatprep.mubr.msk.bf16.mxu1 %vm2302_vm0, %v2301_v1 }
 0x489   :  { %v1474_v53 = vpack.c.bf16 %v1414_v51, %v1414_v51  ;;  %v2166_v55 = vpop.f32.mrb[45].mxu0 }
 0x48a   :  { %v1417_v56 = vpop.f32.mrb[46].mxu0 }
 0x48b   :  { %v2167_v57 = vpop.f32.mrb[47].mxu0  ;;  %2213 = vmatmul.mubr.msk.bf16.vlgmr.msra.gmra.mrb[60].mxu0 %vm573_vm2, %v1474_v53 }
 0x48c   :  { %v1462_v58 = vpop.f32.mrb[44].mxu1 }
 0x48d   :  { %v1475_v59 = vpack.c.bf16 %v1462_v58, %v1462_v58  ;;  %v2172_v52 = vpop.f32.mrb[45].mxu1 }
 0x48e   :  { %v1465_v60 = vpop.f32.mrb[46].mxu1 }
 0x48f   :  { %v2173_v48 = vpop.f32.mrb[47].mxu1  ;;  %2219 = vmatmul.mubr.msk.bf16.vlgmr.msra.gmra.mrb[60].mxu1 %vm573_vm2, %v1475_v59 }
 0x519   :  { %v1524_v44 = vpop.f32.mrb[48].mxu0 }
 0x51a   :  { %v2178_v61 = vpop.f32.mrb[49].mxu0 }
 0x51b   :  { %v1527_v0 = vpop.f32.mrb[50].mxu0 }
 0x51c   :  { %v2179_v54 = vpop.f32.mrb[51].mxu0 }
 0x51d   :  { %v1570_v3 = vpop.f32.mrb[48].mxu1 }
 0x51e   :  { %v1852_v63 = vadd.f32 %v1570_v3, %v1524_v44  ;;  %v2184_v1 = vpop.f32.mrb[49].mxu1 }
 0x51f   :  { %v1573_v4 = vpop.f32.mrb[50].mxu1 }
 0x520   :  { %v2185_v5 = vpop.f32.mrb[51].mxu1 }
 0x521   :  { %v1616_v6 = vpop.f32.mrb[52].mxu0 }
 0x522   :  { %v1854_v7 = vadd.f32 %v1852_v63, %v1616_v6  ;;  %v2190_v8 = vpop.f32.mrb[53].mxu0 }
 0x523   :  { %v1619_v9 = vpop.f32.mrb[54].mxu0 }
 0x524   :  { %v2191_v10 = vpop.f32.mrb[55].mxu0 }
 0x525   :  { %v1662_v11 = vpop.f32.mrb[52].mxu1 }
 0x526   :  { %v1856_v14 = vadd.f32 %v1854_v7, %v1662_v11  ;;  %v2196_v15 = vpop.f32.mrb[53].mxu1 }
 0x527   :  { %v1665_v17 = vpop.f32.mrb[54].mxu1 }
 0x528   :  { %v1865_v2 = vadd.f32 %v1941_v12, %v1856_v14  ;;  %v2197_v62 = vpop.f32.mrb[55].mxu1 }
 0x52a   :  { %1867 = vst.msk [vmem:[#allocation2] sm:$0xff] %vm133_vm1, %v1865_v2 }
 0x556   :  { %v1708_v18 = vpop.f32.mrb[56].mxu0 }
 0x557   :  { %v2202_v19 = vpop.f32.mrb[57].mxu0 }
 0x558   :  { %v1711_v20 = vpop.f32.mrb[58].mxu0 }
 0x559   :  { %v2203_v21 = vpop.f32.mrb[59].mxu0 }
 0x55a   :  { %v1754_v22 = vpop.f32.mrb[56].mxu1 }
 0x55b   :  { %v1853_v23 = vadd.f32 %v1754_v22, %v1708_v18  ;;  %v2208_v24 = vpop.f32.mrb[57].mxu1 }
 0x55c   :  { %v1757_v25 = vpop.f32.mrb[58].mxu1 }
 0x55d   :  { %v2209_v26 = vpop.f32.mrb[59].mxu1 }
 0x55e   :  { %v1800_v27 = vpop.f32.mrb[60].mxu0 }
 0x55f   :  { %v1855_v28 = vadd.f32 %v1853_v23, %v1800_v27  ;;  %v2214_v29 = vpop.f32.mrb[61].mxu0 }
 0x560   :  { %v1803_v30 = vpop.f32.mrb[62].mxu0 }
 0x561   :  { %v2215_v31 = vpop.f32.mrb[63].mxu0 }
 0x562   :  { %v1846_v32 = vpop.f32.mrb[60].mxu1 }
 0x563   :  { %v1857_v33 = vadd.f32 %v1855_v28, %v1846_v32  ;;  %v2220_v34 = vpop.f32.mrb[61].mxu1 }
 0x564   :  { %v1849_v16 = vpop.f32.mrb[62].mxu1 }
 0x565   :  { %v1866_v13 = vadd.f32 %v1941_v12, %v1857_v33  ;;  %v2221_v35 = vpop.f32.mrb[63].mxu1 }
 0x567   :  { %1868 = vst.msk [vmem:[#allocation2 + $0x8] sm:$0xff] %vm133_vm1, %v1866_v13 }
 0x568   :  { %2288 = shalt.err (!%p2285_p4)
}
 0x569   :  { %s2289_s2 = scalar_lea.hbm %s2774_s6, 256 }
 0x56a   :  { %p2290_p5 = scmp.ne.s32.totalorder %s2774_s6, %s2289_s2  ;;  %p2293_p6 = scmp.lt.u32.totalorder %s2289_s2, %s2774_s6 }
 0x56c   :  { %p2295_p7 = pnand %p2293_p6, %p2290_p5 }
 0x56e   :  { %2298 = shalt.err (!%p2295_p7)
}
 0x56f   :  { %s2306_s24 = smov 128   ;;  %s2307_s25 = smov 8  }
 0x570   :  { %1880 = dma.vmem_to_hbm [thread:$0]  %s1875_s17, 256, %s2774_s6, [#allocation3], %s2306_s24, %s2306_s24, %s2307_s25  }
 0x571   :  { %2299 = dma.done.wait [#allocation3], 256  }
 0x572   :  { %2300 = vsyncadd [#allocation3], 4294967040 }
 0x573   :  { %1884 = vsyncpa [#allocation3], 1 }

</bundles_post_ra>
